<compile_context>
chip_gen: v7x
topology: tpu7x:2x2x1
jax: 0.10.0
libtpu: 0.0.40
codegen_flags: <defaults>
</compile_context>

<pallas_src>
import jax
import jax.numpy as jnp
from jax.experimental import pallas as pl
from jax.experimental.pallas import tpu as pltpu


def _round_up(x, m):
    return ((x + m - 1) // m) * m


def _cosnorm_kernel(x_ref, w_ref, invx_ref, invw_ref, o_ref):
    """Grid = (B tiles, C tiles, K tiles); K (feature dim) is the reduction axis.

    o_ref (f32) doubles as the accumulator: its block index is constant over k,
    so the tile stays resident in VMEM across the reduction.  The two
    normalizing scalars (scale/(1+||x_b||) and 1/||w_c||) are precomputed in
    f32 by the wrapper and applied as broadcast multiplies at the last k step.
    """
    k = pl.program_id(2)

    @pl.when(k == 0)
    def _init():
        o_ref[...] = jnp.zeros_like(o_ref)

    # Raw partial dot product on the MXU, accumulated in f32 directly in o_ref.
    o_ref[...] += jax.lax.dot_general(
        x_ref[...], w_ref[...],
        dimension_numbers=(((1,), (1,)), ((), ())),
        preferred_element_type=jnp.float32,
    )

    @pl.when(k == pl.num_programs(2) - 1)
    def _finalize():
        # Row scale (TM, 1) and column scale (1, TN) broadcast over the tile.
        o_ref[...] = o_ref[...] * invx_ref[...] * invw_ref[...]


class CosNormClassifier:
    """CosNorm classifier with weight-side preprocessing cached at init.

    weight: (C, D).  __call__(x) with x: (B, D) returns ((B, C) float32, None).
    compute_dtype: dtype of the MXU operands (bf16 by default; normalization
      and accumulation always stay in float32).
    """

    def __init__(self, weight, scale=16.0, *, compute_dtype=jnp.bfloat16,
                 tm=256, tn=256, tk=2048):
        weight = jnp.asarray(weight)
        C, D = weight.shape
        self.C, self.D = C, D
        self.scale = float(scale)
        self.op_dtype = jnp.dtype(compute_dtype)
        self.sub = 8 if self.op_dtype.itemsize >= 4 else 16   # sublane granularity
        self.tm = tm

        # Lane-dense tiles: TN multiple of 128 for unmasked stores; TK large so
        # typical classifier heads (D <= 2048) do the whole reduction in one k
        # step (x tile then never re-streamed across class tiles).
        self.TN = min(tn, _round_up(C, 128))
        self.TK = min(tk, _round_up(D, 128))
        self.Cp = _round_up(C, self.TN)
        self.Dp = _round_up(D, self.TK)

        # --- Weight-side preprocessing, done ONCE (not per forward call). ---
        # 1/||w_c|| guarded so zero-padded class rows give 0 instead of inf.
        wf = weight.astype(jnp.float32)
        w_sumsq = jnp.sum(wf * wf, axis=1)                               # (C,)
        inv_w = jnp.where(w_sumsq > 0, jax.lax.rsqrt(w_sumsq), 0.0)      # (C,)
        self.inv_w = jnp.pad(inv_w, (0, self.Cp - C)).reshape(1, self.Cp)
        self.inv_w = self.inv_w.astype(jnp.float32)
        # Padded + cast weight (zeros contribute nothing to the dot products).
        self.w_p = jnp.pad(weight, ((0, self.Cp - C), (0, self.Dp - D)))
        self.w_p = self.w_p.astype(self.op_dtype)

    def __call__(self, x):
        B, D = x.shape
        assert D == self.D, "feature dims must match"

        TM = min(self.tm, _round_up(B, self.sub))
        TN, TK = self.TN, self.TK
        Bp = _round_up(B, TM)

        # ||x_b|| from the unquantized (f32) x — tiny (B,) reduction hoisted out
        # of the kernel; folded together with `scale` into one row factor.
        xf = x.astype(jnp.float32)
        norm_x = jnp.sqrt(jnp.sum(xf * xf, axis=1))                      # (B,)
        inv_x = (self.scale / (1.0 + norm_x)).astype(jnp.float32)        # (B,)
        inv_x = jnp.pad(inv_x, (0, Bp - B)).reshape(Bp, 1)

        x_p = jnp.pad(x, ((0, Bp - B), (0, self.Dp - D))).astype(self.op_dtype)

        grid = (Bp // TM, self.Cp // TN, self.Dp // TK)
        # TODO(synk): for very small B on v7x, split C across >=2 j-tiles so both
        # TensorCores get work even when Bp//TM == 1.

        out_p = pl.pallas_call(
            _cosnorm_kernel,
            out_shape=jax.ShapeDtypeStruct((Bp, self.Cp), jnp.float32),
            grid_spec=pltpu.PrefetchScalarGridSpec(
                num_scalar_prefetch=0,
                grid=grid,
                in_specs=[
                    pl.BlockSpec((TM, TK), lambda i, j, k: (i, k)),   # x tile
                    pl.BlockSpec((TN, TK), lambda i, j, k: (j, k)),   # w tile
                    pl.BlockSpec((TM, 1), lambda i, j, k: (i, 0)),    # scale/(1+||x_b||)
                    pl.BlockSpec((1, TN), lambda i, j, k: (0, j)),    # 1/||w_c||
                ],
                out_specs=pl.BlockSpec((TM, TN), lambda i, j, k: (i, j)),
            ),
            compiler_params=pltpu.CompilerParams(
                dimension_semantics=("parallel", "parallel", "arbitrary"),
                vmem_limit_bytes=48 * 1024 * 1024,   # safe on v7x (64 MiB VMEM)
            ),
        )(x_p, self.w_p, inv_x, self.inv_w)

        return out_p[:B, :self.C], None


def cosnorm_classifier(x, weight, scale=16.0, *, compute_dtype=jnp.bfloat16,
                       tm=256, tn=256, tk=2048):
    """One-shot functional wrapper (re-prepares weights every call; prefer the
    CosNormClassifier class when weights are reused)."""
    mod = CosNormClassifier(weight, scale, compute_dtype=compute_dtype,
                            tm=tm, tn=tn, tk=tk)
    return mod(x)


def cosnorm_reference(x, weight, scale=16.0):
    norm_x = jnp.linalg.norm(x, axis=1, keepdims=True)
    ex = norm_x / (1.0 + norm_x) * (x / norm_x)
    ew = weight / jnp.linalg.norm(weight, axis=1, keepdims=True)
    return (scale * ex) @ ew.T


if __name__ == "__main__":
    # Small shapes consistent with the module: batch=8, feat_dim=128, num_classes=16.
    B, D, C = 8, 128, 16
    scale = 16.0

    key = jax.random.PRNGKey(0)
    kx, kw = jax.random.split(key)

    x = jax.random.normal(kx, (B, D), dtype=jnp.float32)
    # Deterministic init mirroring reset_parameters(): uniform(-stdv, stdv).
    stdv = 1.0 / jnp.sqrt(jnp.float32(D))
    weight = jax.random.uniform(kw, (C, D), dtype=jnp.float32,
                                minval=-stdv, maxval=stdv)

    ref = cosnorm_reference(x, weight, scale)

    # f32 MXU-operand path (numerically faithful to the PyTorch module).
    out_f32, _ = cosnorm_classifier(x, weight, scale, compute_dtype=jnp.float32)
    out_f32 = jax.block_until_ready(out_f32)
    assert out_f32.shape == (B, C)
    assert jnp.allclose(out_f32, ref, atol=2e-4, rtol=2e-4), "f32 mismatch vs reference"

    # Default bf16 MXU-operand path (f32 accumulation, f32 norms), weights
    # prepared once via the class.
    mod = CosNormClassifier(weight, scale)          # compute_dtype=bf16 default
    out_bf16, _ = mod(x)
    out_bf16 = jax.block_until_ready(out_bf16)
    assert out_bf16.shape == (B, C)
    assert jnp.allclose(out_bf16, ref, atol=1e-1, rtol=1e-1), "bf16 mismatch vs reference"

    print("KERNEL_OK")
</pallas_src>

<mosaic_0001>
module attributes {stable_mosaic.version = 11 : i64} {
  func.func @_cosnorm_kernel(%arg0: i32, %arg1: i32, %arg2: i32, %arg3: memref<8x128xf32, #tpu.memory_space<vmem>>, %arg4: memref<128x128xf32, #tpu.memory_space<vmem>>, %arg5: memref<8x1xf32, #tpu.memory_space<vmem>>, %arg6: memref<1x128xf32, #tpu.memory_space<vmem>>, %arg7: memref<8x128xf32, #tpu.memory_space<vmem>>) attributes {dimension_semantics = [#tpu.dimension_semantics<parallel>, #tpu.dimension_semantics<parallel>, #tpu.dimension_semantics<arbitrary>], iteration_bounds = array<i64: 1, 1, 1>, scalar_prefetch = 0 : i64, scratch_operands = 0 : i64, tpu.core_type = #tpu.core_type<tc>, window_params = [{transform_indices = @transform_0, window_bounds = array<i64: 8, 128>}, {transform_indices = @transform_1, window_bounds = array<i64: 128, 128>}, {transform_indices = @transform_2, window_bounds = array<i64: 8, 1>}, {transform_indices = @transform_3, window_bounds = array<i64: 1, 128>}, {transform_indices = @transform_4, window_bounds = array<i64: 8, 128>}]} {
    %c0_i32 = arith.constant 0 : i32
    %0 = arith.cmpi eq, %arg2, %c0_i32 : i32
    %1 = arith.extui %0 : i1 to i32
    %c0_i32_0 = arith.constant 0 : i32
    %2 = arith.cmpi ne, %1, %c0_i32_0 : i32
    scf.if %2 {
      %cst_10 = arith.constant 0.000000e+00 : f32
      %12 = vector.broadcast %cst_10 : f32 to vector<8x128xf32>
      %c0_11 = arith.constant 0 : index
      %c0_12 = arith.constant 0 : index
      %13 = vector.load %arg7[%c0_11, %c0_12] : memref<8x128xf32, #tpu.memory_space<vmem>>, vector<8x128xf32>
      tpu.vector_store %arg7[%c0_11, %c0_12], %12 {strides = array<i32>} : memref<8x128xf32, #tpu.memory_space<vmem>>, vector<8x128xf32>,
    } else {
    }
    %c0 = arith.constant 0 : index
    %c0_1 = arith.constant 0 : index
    %3 = vector.load %arg7[%c0, %c0_1] : memref<8x128xf32, #tpu.memory_space<vmem>>, vector<8x128xf32>
    %c0_2 = arith.constant 0 : index
    %c0_3 = arith.constant 0 : index
    %4 = vector.load %arg3[%c0_2, %c0_3] : memref<8x128xf32, #tpu.memory_space<vmem>>, vector<8x128xf32>
    %c0_4 = arith.constant 0 : index
    %c0_5 = arith.constant 0 : index
    %5 = vector.load %arg4[%c0_4, %c0_5] : memref<128x128xf32, #tpu.memory_space<vmem>>, vector<128x128xf32>
    %cst = arith.constant dense<0.000000e+00> : vector<8x128xf32>
    %6 = tpu.matmul %4, %5, %cst {dimension_numbers = #tpu.dot_dimension_numbers<[1], [1], [0], [0], [0, 0, 1, 0], [], []>} : vector<8x128xf32>, vector<128x128xf32>, vector<8x128xf32> -> vector<8x128xf32>
    %7 = arith.addf %3, %6 : vector<8x128xf32>
    %c0_6 = arith.constant 0 : index
    %c0_7 = arith.constant 0 : index
    %8 = vector.load %arg7[%c0_6, %c0_7] : memref<8x128xf32, #tpu.memory_space<vmem>>, vector<8x128xf32>
    tpu.vector_store %arg7[%c0_6, %c0_7], %7 {strides = array<i32>} : memref<8x128xf32, #tpu.memory_space<vmem>>, vector<8x128xf32>,
    %c0_i32_8 = arith.constant 0 : i32
    %9 = arith.cmpi eq, %arg2, %c0_i32_8 : i32
    %10 = arith.extui %9 : i1 to i32
    %c0_i32_9 = arith.constant 0 : i32
    %11 = arith.cmpi ne, %10, %c0_i32_9 : i32
    scf.if %11 {
      %c0_10 = arith.constant 0 : index
      %c0_11 = arith.constant 0 : index
      %12 = vector.load %arg7[%c0_10, %c0_11] : memref<8x128xf32, #tpu.memory_space<vmem>>, vector<8x128xf32>
      %c0_12 = arith.constant 0 : index
      %c0_13 = arith.constant 0 : index
      %13 = vector.load %arg5[%c0_12, %c0_13] : memref<8x1xf32, #tpu.memory_space<vmem>>, vector<8x1xf32>
      %14 = vector.broadcast %13 : vector<8x1xf32> to vector<8x128xf32>
      %15 = arith.mulf %12, %14 : vector<8x128xf32>
      %c0_14 = arith.constant 0 : index
      %c0_15 = arith.constant 0 : index
      %16 = vector.load %arg6[%c0_14, %c0_15] : memref<1x128xf32, #tpu.memory_space<vmem>>, vector<1x128xf32>
      %17 = vector.broadcast %16 : vector<1x128xf32> to vector<8x128xf32>
      %18 = arith.mulf %15, %17 : vector<8x128xf32>
      %c0_16 = arith.constant 0 : index
      %c0_17 = arith.constant 0 : index
      %19 = vector.load %arg7[%c0_16, %c0_17] : memref<8x128xf32, #tpu.memory_space<vmem>>, vector<8x128xf32>
      tpu.vector_store %arg7[%c0_16, %c0_17], %18 {strides = array<i32>} : memref<8x128xf32, #tpu.memory_space<vmem>>, vector<8x128xf32>,
    } else {
    }
    return
  }
  func.func @transform_0(%arg0: i32, %arg1: i32, %arg2: i32) -> (i32, i32) {
    %c0_i32 = arith.constant 0 : i32
    return %arg0, %arg2 : i32, i32
  }
  func.func @transform_1(%arg0: i32, %arg1: i32, %arg2: i32) -> (i32, i32) {
    %c0_i32 = arith.constant 0 : i32
    return %arg1, %arg2 : i32, i32
  }
  func.func @transform_2(%arg0: i32, %arg1: i32, %arg2: i32) -> (i32, i32) {
    %c0_i32 = arith.constant 0 : i32
    %c0_i32_0 = arith.constant 0 : i32
    return %arg0, %c0_i32 : i32, i32
  }
  func.func @transform_3(%arg0: i32, %arg1: i32, %arg2: i32) -> (i32, i32) {
    %c0_i32 = arith.constant 0 : i32
    %c0_i32_0 = arith.constant 0 : i32
    return %c0_i32, %arg1 : i32, i32
  }
  func.func @transform_4(%arg0: i32, %arg1: i32, %arg2: i32) -> (i32, i32) {
    %c0_i32 = arith.constant 0 : i32
    return %arg0, %arg1 : i32, i32
  }
}

</mosaic_0001>

<bundles_post_ra>
// kernel: tpu_custom_call.1
= control target key start
LH: loop header
LB: loop body
LE: loop exit
PB: predicated region body
PF: predicated region fallthrough
CT: control target
= control target key end

     0   :  { %9 = vsyncpa [#allocation3], 0  ;;  %s362_s0 = inlined_call_operand.vmem [shape: f32[8,128], index: 0, kind: input, shape index: {}]   ;;  %s363_s1 = inlined_call_operand.hbm [shape: f32[128,128], index: 1, kind: input, shape index: {}]   ;;  %s364_s2 = inlined_call_operand.vmem [shape: f32[8,1], index: 2, kind: input, shape index: {}]   ;;  %s365_s3 = inlined_call_operand.vmem [shape: f32[1,128], index: 3, kind: input, shape index: {}]   ;;  %s366_s4 = inlined_call_operand.hbm [shape: f32[8,128], index: 4, kind: output, shape index: {}]  }
   0x1   :  { %10 = vsyncpa [#allocation4], 0  ;;  %s296_s15 = smov [#allocation2]   ;;  %s248_s19 = scalar_lea.hbm %s363_s1, 2048 }
   0x2   :  { %s18_s16 = sshll.u32 %s296_s15, 4  ;;  %p249_p0 = scmp.ne.s32.totalorder %s363_s1, %s248_s19  ;;  %s19_s16 = int_to_ptr.vmem [resolvable:$true] %s18_s16 }
   0x3   :  { %p252_p1 = scmp.lt.u32.totalorder %s248_s19, %s363_s1 }
   0x5   :  { %p254_p2 = pnand %p252_p1, %p249_p0 }
   0x7   :  { %257 = shalt.err (!%p254_p2)
}
   0x8   :  { %s258_s24 = scalar_lea.vmem %s19_s16, 2048  ;;  %p263_p4 = scmp.lt.s32.totalorder %s19_s16, %s19_s16 }
   0x9   :  { %p259_p3 = scmp.ne.s32.totalorder %s19_s16, %s258_s24  ;;  %p264_p5 = scmp.lt.s32.totalorder %s258_s24, %s258_s24 }
   0xb   :  { %p265_p6 = por %p264_p5, %p263_p4 }
   0xd   :  { %p266_p7 = pnand %p265_p6, %p259_p3 }
   0xf   :  { %269 = shalt.err (!%p266_p7)
}
  0x10   :  { %s297_s25 = smov 128   ;;  %s298_s26 = smov 8  }
  0x11   :  { %24 = dma.hbm_to_vmem [thread:$0]  %s363_s1, 2048, %s19_s16, [#allocation3], %s297_s25, %s297_s25, %s298_s26  }
  0x12   :  { %292 = dma.done.wait [#allocation3], 2048  }
  0x13   :  { %293 = vsyncadd [#allocation3], 4294965248  ;;  %v299_v0 = vmov 0.0|0.0   ;;  %vm300_vm0 = vmmov 0   ;;  %v301_v1 = vmov 0.0   ;;  %v302_v2 = vmov 0  }
  0x14   :  { %215 = vmatprep.subr.bf16.mxu0 %v299_v0  ;;  %212 = vmatprep.mubr.msk.f32.mxu0 %vm300_vm0, %v301_v1  ;;  %v39_v3 = vld [vmem:[#allocation2] sm:$0xff]  ;;  %v40_v4 = vld [vmem:[#allocation2 + $0x8] sm:$0xff]  ;;  %v41_v6 = vld [vmem:[#allocation2 + $0x10] sm:$0xff]  ;;  %s303_s7 = smov [#allocation5]  }
  0x15   :  { %247 = vset.pattern.permute.xlu0 %v302_v2  ;;  %v216_v5 = vpack.c.bf16 %v40_v4, %v39_v3  ;;  %v42_v7 = vld [vmem:[#allocation2 + $0x18] sm:$0xff]  ;;  %v131_v8 = vld [vmem:[%s364_s2] sm:$0xff]  ;;  %v44_v11 = vld [vmem:[#allocation2 + $0x28] sm:$0xff]  ;;  %s153_s8 = sshll.u32 %s303_s7, 4  ;;  %s154_s8 = int_to_ptr.vmem [resolvable:$true] %s153_s8 }
  0x16   :  { %134 = vperm.xlu0 %247, %v131_v8   ;;  %v219_v9 = vpack.c.bf16 %v42_v7, %v41_v6  ;;  %v43_v10 = vld [vmem:[#allocation2 + $0x20] sm:$0xff]  ;;  %v45_v13 = vld [vmem:[#allocation2 + $0x30] sm:$0xff]  ;;  %v46_v14 = vld [vmem:[#allocation2 + $0x38] sm:$0xff]  ;;  %s270_s9 = scalar_lea.vmem %s154_s8, 128  ;;  %p275_p9 = scmp.lt.s32.totalorder %s154_s8, %s154_s8 }
  0x17   :  { %217 = vmatpush3.bf16.xpose.msra.mxu0 %v216_v5  ;;  %v222_v12 = vpack.c.bf16 %v44_v11, %v43_v10  ;;  %v225_v15 = vpack.c.bf16 %v46_v14, %v45_v13  ;;  %v47_v16 = vld [vmem:[#allocation2 + $0x40] sm:$0xff]  ;;  %v48_v17 = vld [vmem:[#allocation2 + $0x48] sm:$0xff]  ;;  %v49_v19 = vld [vmem:[#allocation2 + $0x50] sm:$0xff]  ;;  %p271_p8 = scmp.ne.s32.totalorder %s154_s8, %s270_s9  ;;  %p276_p10 = scmp.lt.s32.totalorder %s270_s9, %s270_s9 }
  0x18   :  { %218 = vmatprep.subr.bf16.mxu0 %v299_v0  ;;  %v228_v18 = vpack.c.bf16 %v48_v17, %v47_v16  ;;  %v50_v20 = vld [vmem:[#allocation2 + $0x58] sm:$0xff]  ;;  %v51_v22 = vld [vmem:[#allocation2 + $0x60] sm:$0xff]  ;;  %v52_v23 = vld [vmem:[#allocation2 + $0x68] sm:$0xff] }
  0x19   :  { %v231_v21 = vpack.c.bf16 %v50_v20, %v49_v19  ;;  %v234_v24 = vpack.c.bf16 %v52_v23, %v51_v22  ;;  %v53_v25 = vld [vmem:[#allocation2 + $0x70] sm:$0xff]  ;;  %v54_v26 = vld [vmem:[#allocation2 + $0x78] sm:$0xff]  ;;  %v38_v28 = vld [vmem:[%s362_s0] sm:$0xff]  ;;  %p277_p11 = por %p276_p10, %p275_p9 }
  0x1a   :  { %v237_v27 = vpack.c.bf16 %v54_v26, %v53_v25  ;;  %v162_v32 = vld [vmem:[%s365_s3] ss:$0 sm:$0xff] }
  0x1b   :  { %p278_p12 = pnand %p277_p11, %p271_p8 }
  0x1f   :  { %220 = vmatpush3.bf16.xpose.msra.mxu0 %v219_v9 }
  0x20   :  { %221 = vmatprep.subr.bf16.mxu0 %v299_v0 }
  0x27   :  { %223 = vmatpush3.bf16.xpose.msra.mxu0 %v222_v12 }
  0x28   :  { %224 = vmatprep.subr.bf16.mxu0 %v299_v0 }
  0x2f   :  { %226 = vmatpush3.bf16.xpose.msra.mxu0 %v225_v15 }
  0x30   :  { %227 = vmatprep.subr.bf16.mxu0 %v299_v0 }
  0x37   :  { %229 = vmatpush3.bf16.xpose.msra.mxu0 %v228_v18 }
  0x38   :  { %230 = vmatprep.subr.bf16.mxu0 %v299_v0 }
  0x3f   :  { %232 = vmatpush3.bf16.xpose.msra.mxu0 %v231_v21 }
  0x40   :  { %233 = vmatprep.subr.bf16.mxu0 %v299_v0 }
  0x47   :  { %235 = vmatpush3.bf16.xpose.msra.mxu0 %v234_v24 }
  0x48   :  { %236 = vmatprep.subr.bf16.mxu0 %v299_v0 }
  0x4f   :  { %238 = vmatpush3.bf16.xpose.msra.mxu0 %v237_v27 }
  0x56   :  { %213 = vmatmul.mubr.f32.vlgmr.msra.gmra.mrb[0].mxu0 %v38_v28 }
  0x95   :  { %v135_v30 = vpop.permute.xlu0 %134 }
 0x129   :  { %v121_v29 = vpop.f32.mrb[0].mxu0 }
 0x12a   :  { %v214_v31 = vpop.f32.mrb[1].mxu0  ;;  %v137_v33 = vmul.f32 %v135_v30, %v121_v29 }
 0x12c   :  { %v145_v34 = vmul.f32 %v162_v32, %v137_v33 }
 0x12e   :  { %146 = vst [vmem:[#allocation5] sm:$0xff] %v145_v34 }
 0x12f   :  { %281 = shalt.err (!%p278_p12)
}
 0x130   :  { %s282_s11 = scalar_lea.hbm %s366_s4, 128 }
 0x131   :  { %p283_p13 = scmp.ne.s32.totalorder %s366_s4, %s282_s11  ;;  %p286_p0 = scmp.lt.u32.totalorder %s282_s11, %s366_s4 }
 0x133   :  { %p288_p1 = pnand %p286_p0, %p283_p13 }
 0x135   :  { %291 = shalt.err (!%p288_p1)
}
 0x136   :  { %156 = dma.vmem_to_hbm [thread:$0]  %s154_s8, 128, %s366_s4, [#allocation4]  }
 0x137   :  { %294 = dma.done.wait [#allocation4], 128  }
 0x138   :  { %295 = vsyncadd [#allocation4], 4294967168 }
 0x139   :  { %160 = vsyncpa [#allocation3], 1 }
 0x13a   :  { %161 = vsyncpa [#allocation4], 1 }

</bundles_post_ra>
